<compile_context>
chip_gen: v6e
topology: v6e:2x2x1
jax: 0.10.0
libtpu: 0.0.40
codegen_flags: <defaults>
</compile_context>

<pallas_src>
import functools
import math

import jax
import jax.numpy as jnp
import numpy as np
from jax.experimental import pallas as pl
from jax.experimental.pallas import tpu as pltpu


def _round_up(x, m):
    return (x + m - 1) // m * m


# ---------------------------------------------------------------------------
# Pallas kernel: fused BN-affine + ReLU + 3x3 conv as one K-stacked MXU dot
# ---------------------------------------------------------------------------
def _brc_fused_kernel(x_ref, scale_ref, shift_ref, t_ref, bias_ref, o_ref, *, img_h):
    # x_ref:     (BH, Kp)     f32   BH = images_per_block * H rows, lane-padded input
    # scale_ref: (1, Kp)      f32   BN scale per lane (0 on W-pad / lane-pad columns)
    # shift_ref: (1, Kp)      f32   BN shift per lane (0 on pad columns)
    # t_ref:     (3*Kp, Np)   bf16  K-stacked block-Toeplitz conv weights [kh=0;1;2]
    # bias_ref:  (1, Np)      f32
    # o_ref:     (BH, Np)     f32
    bh, _ = x_ref.shape

    # Fused BatchNorm affine + ReLU (VPU, f32). Pad columns have scale=shift=0 -> 0.
    a = jnp.maximum(x_ref[...] * scale_ref[...] + shift_ref[...], 0.0)

    # Vertical (kh) neighbours via sublane rolls; zero at per-image top/bottom rows
    # (this also kills the cyclic wrap of the roll).
    r = jax.lax.broadcasted_iota(jnp.int32, (bh, 1), 0) % img_h
    a_up = jnp.where(r == 0, 0.0, pltpu.roll(a, shift=1, axis=0))            # a[r-1]
    a_dn = jnp.where(r == img_h - 1, 0.0, pltpu.roll(a, shift=bh - 1, axis=0))  # a[r+1]

    # K-stack the three kernel-row slices -> one bf16 MXU dot, f32 accumulation.
    a_cat = jnp.concatenate([a_up, a, a_dn], axis=1).astype(jnp.bfloat16)
    acc = jnp.dot(a_cat, t_ref[...], preferred_element_type=jnp.float32)
    o_ref[...] = (acc + bias_ref[...]).astype(o_ref.dtype)


def _brc_pallas(x2d, scale_row, shift_row, t_flat, bias_row, *, img_h, block_rows):
    rows, kp = x2d.shape
    np_lanes = t_flat.shape[1]
    grid = (rows // block_rows,)
    kernel = functools.partial(_brc_fused_kernel, img_h=img_h)

    def call(single_buffer_consts):
        if single_buffer_consts:
            # Invariant operands: single-buffered (halves their VMEM footprint).
            def const(shape):
                return pl.BlockSpec(shape, lambda i: (0, 0),
                                    pipeline_mode=pl.Buffered(1))
        else:
            def const(shape):
                return pl.BlockSpec(shape, lambda i: (0, 0))
        return pl.pallas_call(
            kernel,
            out_shape=jax.ShapeDtypeStruct((rows, np_lanes), jnp.float32),
            grid_spec=pltpu.PrefetchScalarGridSpec(
                num_scalar_prefetch=0,
                grid=grid,
                in_specs=[
                    pl.BlockSpec((block_rows, kp), lambda i: (i, 0)),   # image-row block
                    const((1, kp)),                                     # BN scale row
                    const((1, kp)),                                     # BN shift row
                    const(t_flat.shape),                                # conv weights
                    const((1, np_lanes)),                               # bias row
                ],
                out_specs=pl.BlockSpec((block_rows, np_lanes), lambda i: (i, 0)),
            ),
            compiler_params=pltpu.CompilerParams(
                dimension_semantics=("parallel",)),
        )(x2d, scale_row, shift_row, t_flat, bias_row)

    try:
        out = call(True)
        return jax.block_until_ready(out)
    except Exception:
        # TODO(synk): drop fallback once pl.Buffered(1) is guaranteed on deployed jax.
        return call(False)


# ---------------------------------------------------------------------------
# Conv weight / bias tables (depend only on conv params -> cache across calls)
# ---------------------------------------------------------------------------
def _build_conv_tables(conv_w, conv_b, *, W, Kw, Kp, WCo, Np):
    # Block-Toeplitz: T[kh, (w+kw)*Cin+ci, w*Cout+co] = conv_w[co, ci, kh, kw].
    S = np.zeros((3, W + 2, W), np.float32)
    for kw in range(3):
        S[kw, kw + np.arange(W), np.arange(W)] = 1.0
    wt_p = jnp.transpose(conv_w.astype(jnp.float32), (2, 3, 1, 0))   # (kh, kw, Cin, Cout)
    T = jnp.einsum('Kpw,hKio->hpiwo', jnp.asarray(S), wt_p)          # (3, W+2, Cin, W, Cout)
    T = T.reshape(3, Kw, WCo)
    T = jnp.pad(T, ((0, 0), (0, Kp - Kw), (0, Np - WCo)))
    t_flat = T.reshape(3 * Kp, Np).astype(jnp.bfloat16)              # K-stacked [kh0;kh1;kh2]

    bias_row = jnp.pad(jnp.tile(conv_b.astype(jnp.float32), W).reshape(1, WCo),
                       ((0, 0), (0, Np - WCo)))
    return t_flat, bias_row


# ---------------------------------------------------------------------------
# BRC forward: BatchNorm2d(Cin) -> ReLU -> Conv2d(Cin, Cout, 3, 1, 1)
# ---------------------------------------------------------------------------
def brc_forward(x_nchw, gamma, beta, conv_w, conv_b, *, eps=1e-5):
    """x_nchw: (N, Cin, H, W); gamma/beta: (Cin,); conv_w: (Cout, Cin, 3, 3) [OIHW];
    conv_b: (Cout,). Returns (N, Cout, H, W)."""
    N, Cin, H, W = x_nchw.shape
    Cout = conv_w.shape[0]
    Kw = (W + 2) * Cin
    Kp = _round_up(Kw, 128)
    WCo = W * Cout
    Np = _round_up(WCo, 128)

    x = x_nchw.astype(jnp.float32)

    # BatchNorm batch statistics in one E[x]/E[x^2] pass (biased var, training-mode
    # normalization semantics of a fresh nn.BatchNorm2d).
    mean = jnp.mean(x, axis=(0, 2, 3))
    ex2 = jnp.mean(x * x, axis=(0, 2, 3))
    var = ex2 - mean * mean
    scale = gamma.astype(jnp.float32) * jax.lax.rsqrt(var + eps)
    shift = beta.astype(jnp.float32) - mean * scale

    # Layout glue: NCHW -> NHWC, pad W by 1 each side, flatten (W+2,Cin) into lanes,
    # zero-pad lanes to a multiple of 128 for unmasked vreg loads.
    x_nhwc = jnp.transpose(x, (0, 2, 3, 1))
    x_pad = jnp.pad(x_nhwc, ((0, 0), (0, 0), (1, 1), (0, 0)))
    x_flat = x_pad.reshape(N, H, Kw)
    if Kp != Kw:
        x_flat = jnp.pad(x_flat, ((0, 0), (0, 0), (0, Kp - Kw)))

    # Row blocking: pack whole images so each grid step's dot has ~256 M rows.
    target_rows = 256
    ipb = max(1, min(N, target_rows // max(1, H)))        # images per block
    align = 8 // math.gcd(H, 8)                           # keep block rows % 8 == 0
    ipb = _round_up(ipb, align)
    n_pad = _round_up(N, ipb)
    block_rows = ipb * H

    x2d = x_flat.reshape(N * H, Kp)
    if n_pad != N:
        x2d = jnp.pad(x2d, ((0, (n_pad - N) * H), (0, 0)))   # fake images, sliced off below

    # BN affine rows, zeroed on W-pad and lane-pad columns so relu() stays 0 there.
    col_valid = np.zeros((W + 2, 1), np.float32)
    col_valid[1:W + 1] = 1.0
    col_valid = jnp.asarray(col_valid)
    scale_row = jnp.pad((col_valid * scale[None, :]).reshape(1, Kw),
                        ((0, 0), (0, Kp - Kw)))
    shift_row = jnp.pad((col_valid * shift[None, :]).reshape(1, Kw),
                        ((0, 0), (0, Kp - Kw)))

    # TODO(synk): cache these tables per conv-weight value across calls.
    t_flat, bias_row = _build_conv_tables(conv_w, conv_b, W=W, Kw=Kw, Kp=Kp,
                                          WCo=WCo, Np=Np)

    out2d = _brc_pallas(x2d, scale_row, shift_row, t_flat, bias_row,
                        img_h=H, block_rows=block_rows)      # (n_pad*H, Np)

    y = out2d[:N * H, :WCo].reshape(N, H, W, Cout)
    return jnp.transpose(y, (0, 3, 1, 2))                    # back to NCHW


# ---------------------------------------------------------------------------
# Pure-JAX reference (f32) for verification
# ---------------------------------------------------------------------------
def ref_brc(x_nchw, gamma, beta, conv_w, conv_b, *, eps=1e-5):
    x = x_nchw.astype(jnp.float32)
    mean = jnp.mean(x, axis=(0, 2, 3), keepdims=True)
    var = jnp.var(x, axis=(0, 2, 3), keepdims=True)
    a = (x - mean) * jax.lax.rsqrt(var + eps)
    a = a * gamma[None, :, None, None] + beta[None, :, None, None]
    a = jnp.maximum(a, 0.0)
    out = jax.lax.conv_general_dilated(
        a, conv_w.astype(jnp.float32), window_strides=(1, 1),
        padding=((1, 1), (1, 1)),
        dimension_numbers=('NCHW', 'OIHW', 'NCHW'))
    return out + conv_b[None, :, None, None]


if __name__ == "__main__":
    key = jax.random.PRNGKey(0)
    k_x, k_g, k_b, k_w, k_c = jax.random.split(key, 5)

    N, Cin, H, W = 2, 4, 16, 16
    Cout = 8

    x = jax.random.normal(k_x, (N, Cin, H, W), dtype=jnp.float32)
    gamma = 1.0 + 0.1 * jax.random.normal(k_g, (Cin,), dtype=jnp.float32)
    beta = 0.1 * jax.random.normal(k_b, (Cin,), dtype=jnp.float32)
    fan = Cin * 3 * 3
    conv_w = jax.random.normal(k_w, (Cout, Cin, 3, 3), dtype=jnp.float32) / np.sqrt(fan)
    conv_b = 0.1 * jax.random.normal(k_c, (Cout,), dtype=jnp.float32)

    y = jax.block_until_ready(brc_forward(x, gamma, beta, conv_w, conv_b))
    assert y.shape == (N, Cout, H, W), y.shape

    y_ref = jax.block_until_ready(ref_brc(x, gamma, beta, conv_w, conv_b))
    # Conv runs as bf16 x bf16 -> f32 on the MXU, so allow ~1e-2 relative error.
    np.testing.assert_allclose(np.asarray(y), np.asarray(y_ref), rtol=2e-2, atol=2e-2)

    print("KERNEL_OK")
</pallas_src>

<mosaic_0001>
module attributes {stable_mosaic.version = 11 : i64} {
  func.func @_brc_fused_kernel(%arg0: i32, %arg1: memref<32x128xf32, #tpu.memory_space<vmem>>, %arg2: memref<1x128xf32, #tpu.memory_space<vmem>>, %arg3: memref<1x128xf32, #tpu.memory_space<vmem>>, %arg4: memref<384x128xbf16, #tpu.memory_space<vmem>>, %arg5: memref<1x128xf32, #tpu.memory_space<vmem>>, %arg6: memref<32x128xf32, #tpu.memory_space<vmem>>) attributes {dimension_semantics = [#tpu.dimension_semantics<parallel>], iteration_bounds = array<i64: 1>, scalar_prefetch = 0 : i64, scratch_operands = 0 : i64, tpu.core_type = #tpu.core_type<tc>, window_params = [{transform_indices = @transform_0, window_bounds = array<i64: 32, 128>}, {pipeline_mode = #tpu.pipeline_mode<synchronous>, transform_indices = @transform_1, window_bounds = array<i64: 1, 128>}, {pipeline_mode = #tpu.pipeline_mode<synchronous>, transform_indices = @transform_2, window_bounds = array<i64: 1, 128>}, {pipeline_mode = #tpu.pipeline_mode<synchronous>, transform_indices = @transform_3, window_bounds = array<i64: 384, 128>}, {pipeline_mode = #tpu.pipeline_mode<synchronous>, transform_indices = @transform_4, window_bounds = array<i64: 1, 128>}, {transform_indices = @transform_5, window_bounds = array<i64: 32, 128>}]} {
    %c0 = arith.constant 0 : index
    %c0_0 = arith.constant 0 : index
    %0 = vector.load %arg1[%c0, %c0_0] : memref<32x128xf32, #tpu.memory_space<vmem>>, vector<32x128xf32>
    %c0_1 = arith.constant 0 : index
    %c0_2 = arith.constant 0 : index
    %1 = vector.load %arg2[%c0_1, %c0_2] : memref<1x128xf32, #tpu.memory_space<vmem>>, vector<1x128xf32>
    %2 = vector.broadcast %1 : vector<1x128xf32> to vector<32x128xf32>
    %3 = arith.mulf %0, %2 : vector<32x128xf32>
    %c0_3 = arith.constant 0 : index
    %c0_4 = arith.constant 0 : index
    %4 = vector.load %arg3[%c0_3, %c0_4] : memref<1x128xf32, #tpu.memory_space<vmem>>, vector<1x128xf32>
    %5 = vector.broadcast %4 : vector<1x128xf32> to vector<32x128xf32>
    %6 = arith.addf %3, %5 : vector<32x128xf32>
    %cst = arith.constant 0.000000e+00 : f32
    %7 = vector.broadcast %cst : f32 to vector<32x128xf32>
    %8 = arith.maximumf %6, %7 : vector<32x128xf32>
    %9 = tpu.iota {dimensions = array<i32: 0>} : vector<32x1xi32>
    %c16_i32 = arith.constant 16 : i32
    %c0_i32 = arith.constant 0 : i32
    %10 = arith.cmpi eq, %c16_i32, %c0_i32 : i32
    %c1_i32 = arith.constant 1 : i32
    %11 = arith.select %10, %c1_i32, %c16_i32 : i32
    %12 = vector.broadcast %11 : i32 to vector<32x1xi32>
    %13 = arith.remsi %9, %12 : vector<32x1xi32>
    %c0_i32_5 = arith.constant 0 : i32
    %14 = vector.broadcast %c0_i32_5 : i32 to vector<32x1xi32>
    %15 = arith.cmpi ne, %13, %14 : vector<32x1xi32>
    %c0_i32_6 = arith.constant 0 : i32
    %16 = vector.broadcast %c0_i32_6 : i32 to vector<32x1xi32>
    %17 = arith.cmpi slt, %13, %16 : vector<32x1xi32>
    %c0_i32_7 = arith.constant 0 : i32
    %18 = arith.cmpi slt, %11, %c0_i32_7 : i32
    %19 = vector.broadcast %18 : i1 to vector<32x1xi1>
    %20 = vector.broadcast %19 : vector<32x1xi1> to vector<32x1xi1>
    %21 = arith.xori %17, %20 : vector<32x1xi1>
    %22 = arith.andi %21, %15 : vector<32x1xi1>
    %23 = vector.broadcast %11 : i32 to vector<32x1xi32>
    %24 = arith.addi %13, %23 : vector<32x1xi32>
    %25 = arith.select %22, %24, %13 : vector<32x1xi1>, vector<32x1xi32>
    %c0_i32_8 = arith.constant 0 : i32
    %26 = vector.broadcast %c0_i32_8 : i32 to vector<32x1xi32>
    %27 = arith.cmpi eq, %25, %26 : vector<32x1xi32>
    %c1_i32_9 = arith.constant 1 : i32
    %28 = tpu.dynamic_rotate %8 by %c1_i32_9 dim 0 : vector<32x128xf32>, i32 -> vector<32x128xf32>
    %cst_10 = arith.constant 0.000000e+00 : f32
    %29 = vector.shape_cast %27 : vector<32x1xi1> to vector<32x1xi1>
    %30 = vector.broadcast %29 : vector<32x1xi1> to vector<32x128xi1>
    %31 = vector.broadcast %cst_10 : f32 to vector<32x128xf32>
    %32 = arith.select %30, %31, %28 : vector<32x128xi1>, vector<32x128xf32>
    %c15_i32 = arith.constant 15 : i32
    %33 = vector.broadcast %c15_i32 : i32 to vector<32x1xi32>
    %34 = arith.cmpi eq, %25, %33 : vector<32x1xi32>
    %c31_i32 = arith.constant 31 : i32
    %35 = tpu.dynamic_rotate %8 by %c31_i32 dim 0 : vector<32x128xf32>, i32 -> vector<32x128xf32>
    %cst_11 = arith.constant 0.000000e+00 : f32
    %36 = vector.shape_cast %34 : vector<32x1xi1> to vector<32x1xi1>
    %37 = vector.broadcast %36 : vector<32x1xi1> to vector<32x128xi1>
    %38 = vector.broadcast %cst_11 : f32 to vector<32x128xf32>
    %39 = arith.select %37, %38, %35 : vector<32x128xi1>, vector<32x128xf32>
    %40 = tpu.concatenate %32, %8, %39 in 1 : vector<32x128xf32>, vector<32x128xf32>, vector<32x128xf32> -> vector<32x384xf32>
    %41 = arith.truncf %40 : vector<32x384xf32> to vector<32x384xbf16>
    %c0_12 = arith.constant 0 : index
    %c0_13 = arith.constant 0 : index
    %42 = vector.load %arg4[%c0_12, %c0_13] : memref<384x128xbf16, #tpu.memory_space<vmem>>, vector<384x128xbf16>
    %cst_14 = arith.constant dense<0.000000e+00> : vector<32x128xf32>
    %43 = tpu.matmul %41, %42, %cst_14 {dimension_numbers = #tpu.dot_dimension_numbers<[1], [0], [0], [1], [0, 0, 1, 1], [], []>} : vector<32x384xbf16>, vector<384x128xbf16>, vector<32x128xf32> -> vector<32x128xf32>
    %c0_15 = arith.constant 0 : index
    %c0_16 = arith.constant 0 : index
    %44 = vector.load %arg5[%c0_15, %c0_16] : memref<1x128xf32, #tpu.memory_space<vmem>>, vector<1x128xf32>
    %45 = vector.broadcast %44 : vector<1x128xf32> to vector<32x128xf32>
    %46 = arith.addf %43, %45 : vector<32x128xf32>
    %c0_17 = arith.constant 0 : index
    %c0_18 = arith.constant 0 : index
    %47 = vector.load %arg6[%c0_17, %c0_18] : memref<32x128xf32, #tpu.memory_space<vmem>>, vector<32x128xf32>
    tpu.vector_store %arg6[%c0_17, %c0_18], %46 {strides = array<i32>} : memref<32x128xf32, #tpu.memory_space<vmem>>, vector<32x128xf32>,
    return
  }
  func.func @transform_0(%arg0: i32) -> (i32, i32) {
    %c0_i32 = arith.constant 0 : i32
    %c0_i32_0 = arith.constant 0 : i32
    return %arg0, %c0_i32 : i32, i32
  }
  func.func @transform_1(%arg0: i32) -> (i32, i32) {
    %c0_i32 = arith.constant 0 : i32
    %c0_i32_0 = arith.constant 0 : i32
    %c0_i32_1 = arith.constant 0 : i32
    return %c0_i32, %c0_i32_0 : i32, i32
  }
  func.func @transform_2(%arg0: i32) -> (i32, i32) {
    %c0_i32 = arith.constant 0 : i32
    %c0_i32_0 = arith.constant 0 : i32
    %c0_i32_1 = arith.constant 0 : i32
    return %c0_i32, %c0_i32_0 : i32, i32
  }
  func.func @transform_3(%arg0: i32) -> (i32, i32) {
    %c0_i32 = arith.constant 0 : i32
    %c0_i32_0 = arith.constant 0 : i32
    %c0_i32_1 = arith.constant 0 : i32
    return %c0_i32, %c0_i32_0 : i32, i32
  }
  func.func @transform_4(%arg0: i32) -> (i32, i32) {
    %c0_i32 = arith.constant 0 : i32
    %c0_i32_0 = arith.constant 0 : i32
    %c0_i32_1 = arith.constant 0 : i32
    return %c0_i32, %c0_i32_0 : i32, i32
  }
  func.func @transform_5(%arg0: i32) -> (i32, i32) {
    %c0_i32 = arith.constant 0 : i32
    %c0_i32_0 = arith.constant 0 : i32
    return %arg0, %c0_i32 : i32, i32
  }
}

module attributes {stable_mosaic.version = 11 : i64} {
  func.func @_brc_fused_kernel(%arg0: i32, %arg1: memref<32x128xf32, #tpu.memory_space<vmem>>, %arg2: memref<1x128xf32, #tpu.memory_space<vmem>>, %arg3: memref<1x128xf32, #tpu.memory_space<vmem>>, %arg4: memref<384x128xbf16, #tpu.memory_space<vmem>>, %arg5: memref<1x128xf32, #tpu.memory_space<vmem>>, %arg6: memref<32x128xf32, #tpu.memory_space<vmem>>) attributes {dimension_semantics = [#tpu.dimension_semantics<parallel>], iteration_bounds = array<i64: 1>, scalar_prefetch = 0 : i64, scratch_operands = 0 : i64, tpu.core_type = #tpu.core_type<tc>, window_params = [{transform_indices = @transform_0, window_bounds = array<i64: 32, 128>}, {pipeline_mode = #tpu.pipeline_mode<synchronous>, transform_indices = @transform_1, window_bounds = array<i64: 1, 128>}, {pipeline_mode = #tpu.pipeline_mode<synchronous>, transform_indices = @transform_2, window_bounds = array<i64: 1, 128>}, {pipeline_mode = #tpu.pipeline_mode<synchronous>, transform_indices = @transform_3, window_bounds = array<i64: 384, 128>}, {pipeline_mode = #tpu.pipeline_mode<synchronous>, transform_indices = @transform_4, window_bounds = array<i64: 1, 128>}, {transform_indices = @transform_5, window_bounds = array<i64: 32, 128>}]} {
    %c0 = arith.constant 0 : index
    %c0_0 = arith.constant 0 : index
    %0 = vector.load %arg1[%c0, %c0_0] : memref<32x128xf32, #tpu.memory_space<vmem>>, vector<32x128xf32>
    %c0_1 = arith.constant 0 : index
    %c0_2 = arith.constant 0 : index
    %1 = vector.load %arg2[%c0_1, %c0_2] : memref<1x128xf32, #tpu.memory_space<vmem>>, vector<1x128xf32>
    %2 = vector.broadcast %1 : vector<1x128xf32> to vector<32x128xf32>
    %3 = arith.mulf %0, %2 : vector<32x128xf32>
    %c0_3 = arith.constant 0 : index
    %c0_4 = arith.constant 0 : index
    %4 = vector.load %arg3[%c0_3, %c0_4] : memref<1x128xf32, #tpu.memory_space<vmem>>, vector<1x128xf32>
    %5 = vector.broadcast %4 : vector<1x128xf32> to vector<32x128xf32>
    %6 = arith.addf %3, %5 : vector<32x128xf32>
    %cst = arith.constant 0.000000e+00 : f32
    %7 = vector.broadcast %cst : f32 to vector<32x128xf32>
    %8 = arith.maximumf %6, %7 : vector<32x128xf32>
    %9 = tpu.iota {dimensions = array<i32: 0>} : vector<32x1xi32>
    %c16_i32 = arith.constant 16 : i32
    %c0_i32 = arith.constant 0 : i32
    %10 = arith.cmpi eq, %c16_i32, %c0_i32 : i32
    %c1_i32 = arith.constant 1 : i32
    %11 = arith.select %10, %c1_i32, %c16_i32 : i32
    %12 = vector.broadcast %11 : i32 to vector<32x1xi32>
    %13 = arith.remsi %9, %12 : vector<32x1xi32>
    %c0_i32_5 = arith.constant 0 : i32
    %14 = vector.broadcast %c0_i32_5 : i32 to vector<32x1xi32>
    %15 = arith.cmpi ne, %13, %14 : vector<32x1xi32>
    %c0_i32_6 = arith.constant 0 : i32
    %16 = vector.broadcast %c0_i32_6 : i32 to vector<32x1xi32>
    %17 = arith.cmpi slt, %13, %16 : vector<32x1xi32>
    %c0_i32_7 = arith.constant 0 : i32
    %18 = arith.cmpi slt, %11, %c0_i32_7 : i32
    %19 = vector.broadcast %18 : i1 to vector<32x1xi1>
    %20 = vector.broadcast %19 : vector<32x1xi1> to vector<32x1xi1>
    %21 = arith.xori %17, %20 : vector<32x1xi1>
    %22 = arith.andi %21, %15 : vector<32x1xi1>
    %23 = vector.broadcast %11 : i32 to vector<32x1xi32>
    %24 = arith.addi %13, %23 : vector<32x1xi32>
    %25 = arith.select %22, %24, %13 : vector<32x1xi1>, vector<32x1xi32>
    %c0_i32_8 = arith.constant 0 : i32
    %26 = vector.broadcast %c0_i32_8 : i32 to vector<32x1xi32>
    %27 = arith.cmpi eq, %25, %26 : vector<32x1xi32>
    %c1_i32_9 = arith.constant 1 : i32
    %28 = tpu.dynamic_rotate %8 by %c1_i32_9 dim 0 : vector<32x128xf32>, i32 -> vector<32x128xf32>
    %cst_10 = arith.constant 0.000000e+00 : f32
    %29 = vector.shape_cast %27 : vector<32x1xi1> to vector<32x1xi1>
    %30 = vector.broadcast %29 : vector<32x1xi1> to vector<32x128xi1>
    %31 = vector.broadcast %cst_10 : f32 to vector<32x128xf32>
    %32 = arith.select %30, %31, %28 : vector<32x128xi1>, vector<32x128xf32>
    %c15_i32 = arith.constant 15 : i32
    %33 = vector.broadcast %c15_i32 : i32 to vector<32x1xi32>
    %34 = arith.cmpi eq, %25, %33 : vector<32x1xi32>
    %c31_i32 = arith.constant 31 : i32
    %35 = tpu.dynamic_rotate %8 by %c31_i32 dim 0 : vector<32x128xf32>, i32 -> vector<32x128xf32>
    %cst_11 = arith.constant 0.000000e+00 : f32
    %36 = vector.shape_cast %34 : vector<32x1xi1> to vector<32x1xi1>
    %37 = vector.broadcast %36 : vector<32x1xi1> to vector<32x128xi1>
    %38 = vector.broadcast %cst_11 : f32 to vector<32x128xf32>
    %39 = arith.select %37, %38, %35 : vector<32x128xi1>, vector<32x128xf32>
    %40 = tpu.concatenate %32, %8, %39 in 1 : vector<32x128xf32>, vector<32x128xf32>, vector<32x128xf32> -> vector<32x384xf32>
    %41 = arith.truncf %40 : vector<32x384xf32> to vector<32x384xbf16>
    %c0_12 = arith.constant 0 : index
    %c0_13 = arith.constant 0 : index
    %42 = vector.load %arg4[%c0_12, %c0_13] : memref<384x128xbf16, #tpu.memory_space<vmem>>, vector<384x128xbf16>
    %cst_14 = arith.constant dense<0.000000e+00> : vector<32x128xf32>
    %43 = tpu.matmul %41, %42, %cst_14 {dimension_numbers = #tpu.dot_dimension_numbers<[1], [0], [0], [1], [0, 0, 1, 1], [], []>} : vector<32x384xbf16>, vector<384x128xbf16>, vector<32x128xf32> -> vector<32x128xf32>
    %c0_15 = arith.constant 0 : index
    %c0_16 = arith.constant 0 : index
    %44 = vector.load %arg5[%c0_15, %c0_16] : memref<1x128xf32, #tpu.memory_space<vmem>>, vector<1x128xf32>
    %45 = vector.broadcast %44 : vector<1x128xf32> to vector<32x128xf32>
    %46 = arith.addf %43, %45 : vector<32x128xf32>
    %c0_17 = arith.constant 0 : index
    %c0_18 = arith.constant 0 : index
    %47 = vector.load %arg6[%c0_17, %c0_18] : memref<32x128xf32, #tpu.memory_space<vmem>>, vector<32x128xf32>
    tpu.vector_store %arg6[%c0_17, %c0_18], %46 {strides = array<i32>} : memref<32x128xf32, #tpu.memory_space<vmem>>, vector<32x128xf32>,
    return
  }
  func.func @transform_0(%arg0: i32) -> (i32, i32) {
    %c0_i32 = arith.constant 0 : i32
    %c0_i32_0 = arith.constant 0 : i32
    return %arg0, %c0_i32 : i32, i32
  }
  func.func @transform_1(%arg0: i32) -> (i32, i32) {
    %c0_i32 = arith.constant 0 : i32
    %c0_i32_0 = arith.constant 0 : i32
    %c0_i32_1 = arith.constant 0 : i32
    return %c0_i32, %c0_i32_0 : i32, i32
  }
  func.func @transform_2(%arg0: i32) -> (i32, i32) {
    %c0_i32 = arith.constant 0 : i32
    %c0_i32_0 = arith.constant 0 : i32
    %c0_i32_1 = arith.constant 0 : i32
    return %c0_i32, %c0_i32_0 : i32, i32
  }
  func.func @transform_3(%arg0: i32) -> (i32, i32) {
    %c0_i32 = arith.constant 0 : i32
    %c0_i32_0 = arith.constant 0 : i32
    %c0_i32_1 = arith.constant 0 : i32
    return %c0_i32, %c0_i32_0 : i32, i32
  }
  func.func @transform_4(%arg0: i32) -> (i32, i32) {
    %c0_i32 = arith.constant 0 : i32
    %c0_i32_0 = arith.constant 0 : i32
    %c0_i32_1 = arith.constant 0 : i32
    return %c0_i32, %c0_i32_0 : i32, i32
  }
  func.func @transform_5(%arg0: i32) -> (i32, i32) {
    %c0_i32 = arith.constant 0 : i32
    %c0_i32_0 = arith.constant 0 : i32
    return %arg0, %c0_i32 : i32, i32
  }
}

</mosaic_0001>

<bundles_post_ra>
// kernel: tpu_custom_call.1
= control target key start
LH: loop header
LB: loop body
LE: loop exit
PB: predicated region body
PF: predicated region fallthrough
CT: control target
= control target key end

     0   :  { %10 = vsyncpa [#allocation3], 0  ;;  %s813_s0 = inlined_call_operand.hbm [shape: f32[32,128], index: 0, kind: input, shape index: {}]   ;;  %s814_s1 = inlined_call_operand.vmem [shape: f32[1,128], index: 1, kind: input, shape index: {}]   ;;  %s815_s2 = inlined_call_operand.vmem [shape: f32[1,128], index: 2, kind: input, shape index: {}]   ;;  %s816_s3 = inlined_call_operand.hbm [shape: bf16[384,128], index: 3, kind: input, shape index: {}]   ;;  %s817_s4 = inlined_call_operand.vmem [shape: f32[1,128], index: 4, kind: input, shape index: {}]   ;;  %s818_s5 = inlined_call_operand.hbm [shape: f32[32,128], index: 5, kind: output, shape index: {}]  }
   0x1   :  { %11 = vsyncpa [#allocation6], 0 }
   0x2   :  { %12 = vsyncpa [#allocation4], 0  ;;  %s711_s18 = smov [#allocation2]  }
   0x3   :  { %s18_s19 = sshll.u32 %s711_s18, 4  ;;  %s19_s19 = int_to_ptr.vmem [resolvable:$true] %s18_s19 }
   0x4   :  { %s653_s20 = scalar_lea.vmem %s19_s19, 512  ;;  %p658_p1 = scmp.lt.s32.totalorder %s19_s19, %s19_s19 }
   0x5   :  { %p654_p0 = scmp.ne.s32.totalorder %s19_s19, %s653_s20  ;;  %p659_p2 = scmp.lt.s32.totalorder %s653_s20, %s653_s20 }
   0x7   :  { %p660_p3 = por %p659_p2, %p658_p1 }
   0x9   :  { %p661_p4 = pnand %p660_p3, %p654_p0 }
   0xb   :  { %664 = shalt.err (!%p661_p4)
}
   0xc   :  { %s712_s21 = smov 128   ;;  %s713_s22 = smov 8  }
   0xd   :  { %24 = dma.hbm_to_vmem [thread:$0]  %s813_s0, 512, %s19_s19, [#allocation3], %s712_s21, %s712_s21, %s713_s22  }
   0xe   :  { %s714_s25 = smov [#allocation5]  }
   0xf   :  { %s34_s26 = sshll.u32 %s714_s25, 4  ;;  %s35_s26 = int_to_ptr.vmem [resolvable:$true] %s34_s26 }
  0x10   :  { %s673_s27 = scalar_lea.vmem %s35_s26, 3072  ;;  %p678_p6 = scmp.lt.s32.totalorder %s35_s26, %s35_s26 }
  0x11   :  { %p674_p5 = scmp.ne.s32.totalorder %s35_s26, %s673_s27  ;;  %p679_p7 = scmp.lt.s32.totalorder %s673_s27, %s673_s27 }
  0x13   :  { %p680_p8 = por %p679_p7, %p678_p6 }
  0x15   :  { %p681_p9 = pnand %p680_p8, %p674_p5 }
  0x17   :  { %684 = shalt.err (!%p681_p9)
}
  0x18   :  { %s715_s28 = smov 64   ;;  %s716_s29 = smov 4  }
  0x19   :  { %40 = dma.hbm_to_vmem [thread:$0]  %s816_s3, 3072, %s35_s26, [#allocation6], %s715_s28, %s715_s28, %s716_s29  }
  0x1a   :  { %705 = dma.done.wait [#allocation3], 512  }
  0x1b   :  { %706 = vsyncadd [#allocation3], 4294966784 }
  0x1c   :  { %707 = dma.done.wait [#allocation6], 3072  }
  0x1d   :  { %708 = vsyncadd [#allocation6], 4294964224  ;;  %v621_v0 = vld [vmem:[#allocation5 + $0x78] sm:$0xff]   ;;  %v623_v2 = vld [vmem:[#allocation5 + $0x70] sm:$0xff]   ;;  %v80_v14 = vlaneseq  ;;  %vm717_vm4 = vmmov 1  }
  0x1e   :  { %v622_v1 = vld [vmem:[#allocation5 + $0x38] sm:$0xff]   ;;  %555 = vmatprep.subr.bf16.mxu0 %v621_v0  ;;  %v625_v4 = vld [vmem:[#allocation5 + $0x30] sm:$0xff]   ;;  %v626_v5 = vld [vmem:[#allocation5 + $0x68] sm:$0xff]  }
  0x1f   :  { %556 = vmatpush3.bf16.msra.mxu0 %v622_v1  ;;  %v624_v3 = vld [vmem:[#allocation5 + $0xb8] sm:$0xff]   ;;  %v627_v6 = vld [vmem:[#allocation5 + $0xb0] sm:$0xff]   ;;  %v628_v7 = vld [vmem:[#allocation5 + $0x28] sm:$0xff]   ;;  %v758_v18 = vshrl.u32 %v80_v14, 7 }
  0x20   :  { %557 = vmatprep.subr.bf16.mxu0 %v623_v2  ;;  %593 = vmatprep.subr.bf16.mxu1 %v624_v3  ;;  %v629_v8 = vld [vmem:[#allocation5 + $0x60] sm:$0xff]   ;;  %v630_v9 = vld [vmem:[#allocation5 + $0xa8] sm:$0xff]   ;;  %v632_v11 = vld [vmem:[#allocation5 + $0x58] sm:$0xff]  }
  0x21   :  { %594 = vmatpush3.bf16.msra.mxu1 %v624_v3  ;;  %v631_v10 = vld [vmem:[#allocation5 + $0x20] sm:$0xff]   ;;  %v634_v13 = vld [vmem:[#allocation5 + $0x18] sm:$0xff]   ;;  %v635_v16 = vld [vmem:[#allocation5 + $0x50] sm:$0xff]   ;;  %v82_v23 = vadd.s32 8, %v758_v18  ;;  %v84_v33 = vadd.s32 24, %v758_v18  ;;  %v89_v34 = vand.u32 15, %v758_v18 }
  0x22   :  { %595 = vmatprep.subr.bf16.mxu1 %v627_v6  ;;  %v633_v12 = vld [vmem:[#allocation5 + $0xa0] sm:$0xff]   ;;  %v636_v15 = vld [vmem:[#allocation5 + $0x98] sm:$0xff]   ;;  %v637_v17 = vld [vmem:[#allocation5 + $0x10] sm:$0xff]   ;;  %vm141_vm0 = vcmp.lt.s32.totalorder %v758_v18, 1  ;;  %v83_v43 = vadd.s32 16, %v758_v18  ;;  %vm166_vm2 = vcmp.lt.s32.totalorder %v758_v18, 7 }
  0x23   :  { %558 = vmatpush3.bf16.msra.mxu0 %v625_v4  ;;  %v639_v19 = vld [vmem:[#allocation5 + $0x90] sm:$0xff]   ;;  %v638_v20 = vld [vmem:[#allocation5 + $0x48] sm:$0xff]   ;;  %v50_v24 = vld [vmem:[#allocation2] sm:$0xff]  ;;  %v96_v36 = vand.u32 15, %v82_v23  ;;  %v110_v47 = vand.u32 15, %v84_v33  ;;  %vm771_vm1 = vcmp.ne.s32.totalorder %v89_v34, 0 }
  0x24   :  { %559 = vmatprep.subr.bf16.mxu0 %v626_v5  ;;  %v640_v21 = vld [vmem:[#allocation5 + $0x8] sm:$0xff]   ;;  %v53_v26 = vld [vmem:[#allocation2 + $0x18] sm:$0xff]  ;;  %v641_v27 = vld [vmem:[#allocation5 + $0x40] sm:$0xff]   ;;  %v103_v61 = vand.u32 15, %v83_v43 }
  0x25   :  { %596 = vmatpush3.bf16.msra.mxu1 %v627_v6  ;;  %v642_v22 = vld [vmem:[#allocation5 + $0x88] sm:$0xff]   ;;  %v508_v28 = vld [vmem:[%s814_s1] ss:$0 sm:$0xff]  ;;  %v52_v35 = vld [vmem:[#allocation2 + $0x10] sm:$0xff]  ;;  %vm776_vm3 = vcmp.ne.s32.totalorder %v96_v36, 15  ;;  %vm554_vm6 = vcmp.ne.s32.totalorder %v110_v47, 15 }
  0x26   :  { %597 = vmatprep.subr.bf16.mxu1 %v630_v9  ;;  %v51_v25 = vld [vmem:[#allocation2 + $0x8] sm:$0xff]  ;;  %v509_v29 = vld [vmem:[%s815_s2] ss:$0 sm:$0xff]  ;;  %v61_v30 = vmul.f32 %v508_v28, %v50_v24  ;;  %v64_v32 = vmul.f32 %v508_v28, %v53_v26  ;;  %v63_v42 = vmul.f32 %v508_v28, %v52_v35  ;;  %vm536_vm5 = vmpackc.low %vm717_vm4, %vm771_vm1  ;;  %vm552_vm9 = vcmp.ne.s32.totalorder %v103_v61, 0 }
  0x27   :  { %560 = vmatpush3.bf16.msra.mxu0 %v628_v7  ;;  %v62_v31 = vmul.f32 %v508_v28, %v51_v25  ;;  %v643_v37 = vld [vmem:[#allocation5] sm:$0xff]   ;;  %vm544_vm7 = vmpackc.low %vm776_vm3, %vm717_vm4 }
  0x28   :  { %561 = vmatprep.subr.bf16.mxu0 %v629_v8  ;;  %v72_v38 = vadd.f32 %v509_v29, %v61_v30  ;;  %v75_v40 = vadd.f32 %v509_v29, %v64_v32  ;;  %v644_v41 = vld [vmem:[#allocation5 + $0x80] sm:$0xff]   ;;  %v74_v49 = vadd.f32 %v509_v29, %v63_v42  ;;  %vm548_vm8 = vmpackc.low %vm554_vm6, %vm717_vm4 }
  0x29   :  { %598 = vmatpush3.bf16.msra.mxu1 %v630_v9  ;;  %v73_v39 = vadd.f32 %v509_v29, %v62_v31  ;;  %vm540_vm10 = vmpackc.low %vm717_vm4, %vm552_vm9 }
  0x2a   :  { %599 = vmatprep.subr.bf16.mxu1 %v633_v12  ;;  %v76_v44 = vmax.f32 %v72_v38, 0.0  ;;  %v79_v46 = vmax.f32 %v75_v40, 0.0  ;;  %v78_v55 = vmax.f32 %v74_v49, 0.0 }
  0x2b   :  { %562 = vmatpush3.bf16.msra.mxu0 %v631_v10  ;;  %v77_v45 = vmax.f32 %v73_v39, 0.0 }
  0x2c   :  { %563 = vmatprep.subr.bf16.mxu0 %v632_v11  ;;  %v137_v51 = vrot.slane %v76_v44, 7  ;;  %v140_v54 = vrot.slane %v79_v46, 7  ;;  %v162_v56 = vrot.slane %v76_v44, 1  ;;  %v165_v58 = vrot.slane %v79_v46, 1 }
  0x2d   :  { %600 = vmatpush3.bf16.msra.mxu1 %v633_v12  ;;  %v138_v52 = vrot.slane %v77_v45, 7  ;;  %v184_v53 = vpack.c.bf16 %v77_v45, %v76_v44  ;;  %v163_v57 = vrot.slane %v77_v45, 1  ;;  %v164_v63 = vrot.slane %v78_v55, 1 }
  0x2e   :  { %601 = vmatprep.subr.bf16.mxu1 %v636_v15  ;;  %v145_v60 = vsel %vm141_vm0, %v140_v54, %v137_v51  ;;  %v170_v1 = vsel %vm166_vm2, %v165_v58, %v162_v56  ;;  %v187_v2 = vpack.c.bf16 %v79_v46, %v78_v55  ;;  %v139_v3 = vrot.slane %v78_v55, 7 }
  0x2f   :  { %564 = vmatpush3.bf16.msra.mxu0 %v634_v13  ;;  %420 = vmatprep.mubr.bf16.mxu0 %v184_v53  ;;  %v144_v59 = vsel %vm141_vm0, %v137_v51, %v138_v52  ;;  %v169_v0 = vsel %vm166_vm2, %v162_v56, %v163_v57  ;;  %v168_v4 = vsel %vm166_vm2, %v163_v57, %v164_v63  ;;  %v510_v13 = vld [vmem:[%s817_s4] ss:$0 sm:$0xff]  ;;  %s718_s4 = smov [#allocation7]  }
  0x30   :  { %565 = vmatprep.subr.bf16.mxu0 %v635_v16  ;;  %v537_v62 = vpack.c.bf16 %v144_v59, %v145_v60  ;;  %v167_v5 = vsel %vm166_vm2, %v164_v63, %v165_v58  ;;  %v545_v6 = vpack.c.bf16 %v168_v4, %v169_v0  ;;  %v142_v8 = vsel %vm141_vm0, %v139_v3, %v140_v54  ;;  %s495_s9 = sshll.u32 %s718_s4, 4  ;;  %s496_s9 = int_to_ptr.vmem [resolvable:$true] %s495_s9 }
  0x31   :  { %602 = vmatpush3.bf16.msra.mxu1 %v636_v15  ;;  %v549_v7 = vpack.c.bf16 %v170_v1, %v167_v5  ;;  %v143_v9 = vsel %vm141_vm0, %v138_v52, %v139_v3  ;;  %s685_s10 = scalar_lea.vmem %s496_s9, 512  ;;  %p690_p11 = scmp.lt.s32.totalorder %s496_s9, %s496_s9 }
  0x32   :  { %603 = vmatprep.subr.bf16.mxu1 %v639_v19  ;;  %609 = vmatprep.mubr.msk.bf16.mxu1 %vm544_vm7, %v545_v6  ;;  %v541_v10 = vpack.c.bf16 %v142_v8, %v143_v9  ;;  %p686_p10 = scmp.ne.s32.totalorder %s496_s9, %s685_s10  ;;  %p691_p12 = scmp.lt.s32.totalorder %s685_s10, %s685_s10 }
  0x33   :  { %566 = vmatpush3.bf16.msra.mxu0 %v637_v17 }
  0x34   :  { %567 = vmatprep.subr.bf16.mxu0 %v638_v20  ;;  %p692_p13 = por %p691_p12, %p690_p11 }
  0x35   :  { %604 = vmatpush3.bf16.msra.mxu1 %v639_v19 }
  0x36   :  { %605 = vmatprep.subr.bf16.mxu1 %v642_v22  ;;  %p693_p0 = pnand %p692_p13, %p686_p10 }
  0x37   :  { %568 = vmatpush3.bf16.msra.mxu0 %v640_v21 }
  0x38   :  { %569 = vmatprep.subr.bf16.mxu0 %v641_v27 }
  0x39   :  { %606 = vmatpush3.bf16.msra.mxu1 %v642_v22 }
  0x3a   :  { %607 = vmatprep.subr.bf16.mxu1 %v644_v41 }
  0x3b   :  { %570 = vmatpush3.bf16.msra.mxu0 %v643_v37 }
  0x3d   :  { %608 = vmatpush3.bf16.msra.mxu1 %v644_v41 }
  0x3e   :  { %538 = vmatmul.mubr.msk.bf16.vlgmr.msra.gmra.mxu0 %vm536_vm5, %v537_v62 }
  0x3f   :  { %428 = vmatprep.mubr.bf16.mxu0 %v187_v2 }
  0x40   :  { %610 = vmatmul.mubr.msk.bf16.vlgmr.msra.gmra.mxu1 %vm548_vm8, %v549_v7 }
  0x46   :  { %542 = vmatmul.mubr.msk.bf16.gmra.mxu0 %vm540_vm10, %v541_v10 }
  0xfe   :  { %v571_v11 = vpop.f32.mrf.mxu0 }
 0x100   :  { %v572_v12 = vpop.f32.mrf.mxu0  ;;  %v611_v16 = vpop.f32.mrf.mxu1 }
 0x101   :  { %v573_v14 = vadd.f32 %v572_v12, %v571_v11 }
 0x102   :  { %v574_v15 = vpop.f32.mrf.mxu0  ;;  %v471_v18 = vpop.f32.mrf.mxu1 }
 0x103   :  { %v423_v17 = vadd.f32 %v573_v14, %v510_v13 }
 0x104   :  { %v575_v19 = vpop.f32.mrf.mxu0  ;;  %v612_v23 = vpop.f32.mrf.mxu1 }
 0x105   :  { %v576_v20 = vadd.f32 %v575_v19, %v574_v15  ;;  %v472_v21 = vadd.f32 %v471_v18, %v423_v17 }
 0x106   :  { %v577_v22 = vpop.f32.mrf.mxu0  ;;  %v474_v26 = vpop.f32.mrf.mxu1 }
 0x107   :  { %486 = vst [vmem:[#allocation7] sm:$0xff] %v472_v21  ;;  %v426_v24 = vadd.f32 %v576_v20, %v510_v13 }
 0x108   :  { %v578_v25 = vpop.f32.mrf.mxu0 }
 0x109   :  { %v579_v27 = vadd.f32 %v578_v25, %v577_v22  ;;  %v475_v28 = vadd.f32 %v474_v26, %v426_v24 }
 0x10a   :  { %v580_v29 = vpop.f32.mrf.mxu0 }
 0x10b   :  { %v431_v30 = vadd.f32 %v579_v27, %v510_v13  ;;  %487 = vst [vmem:[#allocation7 + $0x8] sm:$0xff] %v475_v28 }
 0x10c   :  { %v581_v31 = vpop.f32.mrf.mxu0 }
 0x10d   :  { %v480_v32 = vadd.f32 %v611_v16, %v431_v30  ;;  %v582_v33 = vadd.f32 %v581_v31, %v580_v29 }
 0x10f   :  { %488 = vst [vmem:[#allocation7 + $0x10] sm:$0xff] %v480_v32  ;;  %v434_v34 = vadd.f32 %v582_v33, %v510_v13 }
 0x111   :  { %v483_v35 = vadd.f32 %v612_v23, %v434_v34 }
 0x113   :  { %489 = vst [vmem:[#allocation7 + $0x18] sm:$0xff] %v483_v35 }
 0x114   :  { %696 = shalt.err (!%p693_p0)
}
 0x115   :  { %501 = dma.vmem_to_hbm [thread:$0]  %s496_s9, 512, %s818_s5, [#allocation4], %s712_s21, %s712_s21, %s713_s22  }
 0x116   :  { %709 = dma.done.wait [#allocation4], 512  }
 0x117   :  { %710 = vsyncadd [#allocation4], 4294966784 }
 0x118   :  { %505 = vsyncpa [#allocation3], 1 }
 0x119   :  { %506 = vsyncpa [#allocation6], 1 }
 0x11a   :  { %507 = vsyncpa [#allocation4], 1 }

// kernel: tpu_custom_call.1
= control target key start
LH: loop header
LB: loop body
LE: loop exit
PB: predicated region body
PF: predicated region fallthrough
CT: control target
= control target key end

     0   :  { %10 = vsyncpa [#allocation3], 0  ;;  %s813_s0 = inlined_call_operand.hbm [shape: f32[32,128], index: 0, kind: input, shape index: {}]   ;;  %s814_s1 = inlined_call_operand.vmem [shape: f32[1,128], index: 1, kind: input, shape index: {}]   ;;  %s815_s2 = inlined_call_operand.vmem [shape: f32[1,128], index: 2, kind: input, shape index: {}]   ;;  %s816_s3 = inlined_call_operand.hbm [shape: bf16[384,128], index: 3, kind: input, shape index: {}]   ;;  %s817_s4 = inlined_call_operand.vmem [shape: f32[1,128], index: 4, kind: input, shape index: {}]   ;;  %s818_s5 = inlined_call_operand.hbm [shape: f32[32,128], index: 5, kind: output, shape index: {}]  }
   0x1   :  { %11 = vsyncpa [#allocation6], 0 }
   0x2   :  { %12 = vsyncpa [#allocation4], 0  ;;  %s711_s18 = smov [#allocation2]  }
   0x3   :  { %s18_s19 = sshll.u32 %s711_s18, 4  ;;  %s19_s19 = int_to_ptr.vmem [resolvable:$true] %s18_s19 }
   0x4   :  { %s653_s20 = scalar_lea.vmem %s19_s19, 512  ;;  %p658_p1 = scmp.lt.s32.totalorder %s19_s19, %s19_s19 }
   0x5   :  { %p654_p0 = scmp.ne.s32.totalorder %s19_s19, %s653_s20  ;;  %p659_p2 = scmp.lt.s32.totalorder %s653_s20, %s653_s20 }
   0x7   :  { %p660_p3 = por %p659_p2, %p658_p1 }
   0x9   :  { %p661_p4 = pnand %p660_p3, %p654_p0 }
   0xb   :  { %664 = shalt.err (!%p661_p4)
}
   0xc   :  { %s712_s21 = smov 128   ;;  %s713_s22 = smov 8  }
   0xd   :  { %24 = dma.hbm_to_vmem [thread:$0]  %s813_s0, 512, %s19_s19, [#allocation3], %s712_s21, %s712_s21, %s713_s22  }
   0xe   :  { %s714_s25 = smov [#allocation5]  }
   0xf   :  { %s34_s26 = sshll.u32 %s714_s25, 4  ;;  %s35_s26 = int_to_ptr.vmem [resolvable:$true] %s34_s26 }
  0x10   :  { %s673_s27 = scalar_lea.vmem %s35_s26, 3072  ;;  %p678_p6 = scmp.lt.s32.totalorder %s35_s26, %s35_s26 }
  0x11   :  { %p674_p5 = scmp.ne.s32.totalorder %s35_s26, %s673_s27  ;;  %p679_p7 = scmp.lt.s32.totalorder %s673_s27, %s673_s27 }
  0x13   :  { %p680_p8 = por %p679_p7, %p678_p6 }
  0x15   :  { %p681_p9 = pnand %p680_p8, %p674_p5 }
  0x17   :  { %684 = shalt.err (!%p681_p9)
}
  0x18   :  { %s715_s28 = smov 64   ;;  %s716_s29 = smov 4  }
  0x19   :  { %40 = dma.hbm_to_vmem [thread:$0]  %s816_s3, 3072, %s35_s26, [#allocation6], %s715_s28, %s715_s28, %s716_s29  }
  0x1a   :  { %705 = dma.done.wait [#allocation3], 512  }
  0x1b   :  { %706 = vsyncadd [#allocation3], 4294966784 }
  0x1c   :  { %707 = dma.done.wait [#allocation6], 3072  }
  0x1d   :  { %708 = vsyncadd [#allocation6], 4294964224  ;;  %v621_v0 = vld [vmem:[#allocation5 + $0x78] sm:$0xff]   ;;  %v623_v2 = vld [vmem:[#allocation5 + $0x70] sm:$0xff]   ;;  %v80_v14 = vlaneseq  ;;  %vm717_vm4 = vmmov 1  }
  0x1e   :  { %v622_v1 = vld [vmem:[#allocation5 + $0x38] sm:$0xff]   ;;  %555 = vmatprep.subr.bf16.mxu0 %v621_v0  ;;  %v625_v4 = vld [vmem:[#allocation5 + $0x30] sm:$0xff]   ;;  %v626_v5 = vld [vmem:[#allocation5 + $0x68] sm:$0xff]  }
  0x1f   :  { %556 = vmatpush3.bf16.msra.mxu0 %v622_v1  ;;  %v624_v3 = vld [vmem:[#allocation5 + $0xb8] sm:$0xff]   ;;  %v627_v6 = vld [vmem:[#allocation5 + $0xb0] sm:$0xff]   ;;  %v628_v7 = vld [vmem:[#allocation5 + $0x28] sm:$0xff]   ;;  %v758_v18 = vshrl.u32 %v80_v14, 7 }
  0x20   :  { %557 = vmatprep.subr.bf16.mxu0 %v623_v2  ;;  %593 = vmatprep.subr.bf16.mxu1 %v624_v3  ;;  %v629_v8 = vld [vmem:[#allocation5 + $0x60] sm:$0xff]   ;;  %v630_v9 = vld [vmem:[#allocation5 + $0xa8] sm:$0xff]   ;;  %v632_v11 = vld [vmem:[#allocation5 + $0x58] sm:$0xff]  }
  0x21   :  { %594 = vmatpush3.bf16.msra.mxu1 %v624_v3  ;;  %v631_v10 = vld [vmem:[#allocation5 + $0x20] sm:$0xff]   ;;  %v634_v13 = vld [vmem:[#allocation5 + $0x18] sm:$0xff]   ;;  %v635_v16 = vld [vmem:[#allocation5 + $0x50] sm:$0xff]   ;;  %v82_v23 = vadd.s32 8, %v758_v18  ;;  %v84_v33 = vadd.s32 24, %v758_v18  ;;  %v89_v34 = vand.u32 15, %v758_v18 }
  0x22   :  { %595 = vmatprep.subr.bf16.mxu1 %v627_v6  ;;  %v633_v12 = vld [vmem:[#allocation5 + $0xa0] sm:$0xff]   ;;  %v636_v15 = vld [vmem:[#allocation5 + $0x98] sm:$0xff]   ;;  %v637_v17 = vld [vmem:[#allocation5 + $0x10] sm:$0xff]   ;;  %vm141_vm0 = vcmp.lt.s32.totalorder %v758_v18, 1  ;;  %v83_v43 = vadd.s32 16, %v758_v18  ;;  %vm166_vm2 = vcmp.lt.s32.totalorder %v758_v18, 7 }
  0x23   :  { %558 = vmatpush3.bf16.msra.mxu0 %v625_v4  ;;  %v639_v19 = vld [vmem:[#allocation5 + $0x90] sm:$0xff]   ;;  %v638_v20 = vld [vmem:[#allocation5 + $0x48] sm:$0xff]   ;;  %v50_v24 = vld [vmem:[#allocation2] sm:$0xff]  ;;  %v96_v36 = vand.u32 15, %v82_v23  ;;  %v110_v47 = vand.u32 15, %v84_v33  ;;  %vm771_vm1 = vcmp.ne.s32.totalorder %v89_v34, 0 }
  0x24   :  { %559 = vmatprep.subr.bf16.mxu0 %v626_v5  ;;  %v640_v21 = vld [vmem:[#allocation5 + $0x8] sm:$0xff]   ;;  %v53_v26 = vld [vmem:[#allocation2 + $0x18] sm:$0xff]  ;;  %v641_v27 = vld [vmem:[#allocation5 + $0x40] sm:$0xff]   ;;  %v103_v61 = vand.u32 15, %v83_v43 }
  0x25   :  { %596 = vmatpush3.bf16.msra.mxu1 %v627_v6  ;;  %v642_v22 = vld [vmem:[#allocation5 + $0x88] sm:$0xff]   ;;  %v508_v28 = vld [vmem:[%s814_s1] ss:$0 sm:$0xff]  ;;  %v52_v35 = vld [vmem:[#allocation2 + $0x10] sm:$0xff]  ;;  %vm776_vm3 = vcmp.ne.s32.totalorder %v96_v36, 15  ;;  %vm554_vm6 = vcmp.ne.s32.totalorder %v110_v47, 15 }
  0x26   :  { %597 = vmatprep.subr.bf16.mxu1 %v630_v9  ;;  %v51_v25 = vld [vmem:[#allocation2 + $0x8] sm:$0xff]  ;;  %v509_v29 = vld [vmem:[%s815_s2] ss:$0 sm:$0xff]  ;;  %v61_v30 = vmul.f32 %v508_v28, %v50_v24  ;;  %v64_v32 = vmul.f32 %v508_v28, %v53_v26  ;;  %v63_v42 = vmul.f32 %v508_v28, %v52_v35  ;;  %vm536_vm5 = vmpackc.low %vm717_vm4, %vm771_vm1  ;;  %vm552_vm9 = vcmp.ne.s32.totalorder %v103_v61, 0 }
  0x27   :  { %560 = vmatpush3.bf16.msra.mxu0 %v628_v7  ;;  %v62_v31 = vmul.f32 %v508_v28, %v51_v25  ;;  %v643_v37 = vld [vmem:[#allocation5] sm:$0xff]   ;;  %vm544_vm7 = vmpackc.low %vm776_vm3, %vm717_vm4 }
  0x28   :  { %561 = vmatprep.subr.bf16.mxu0 %v629_v8  ;;  %v72_v38 = vadd.f32 %v509_v29, %v61_v30  ;;  %v75_v40 = vadd.f32 %v509_v29, %v64_v32  ;;  %v644_v41 = vld [vmem:[#allocation5 + $0x80] sm:$0xff]   ;;  %v74_v49 = vadd.f32 %v509_v29, %v63_v42  ;;  %vm548_vm8 = vmpackc.low %vm554_vm6, %vm717_vm4 }
  0x29   :  { %598 = vmatpush3.bf16.msra.mxu1 %v630_v9  ;;  %v73_v39 = vadd.f32 %v509_v29, %v62_v31  ;;  %vm540_vm10 = vmpackc.low %vm717_vm4, %vm552_vm9 }
  0x2a   :  { %599 = vmatprep.subr.bf16.mxu1 %v633_v12  ;;  %v76_v44 = vmax.f32 %v72_v38, 0.0  ;;  %v79_v46 = vmax.f32 %v75_v40, 0.0  ;;  %v78_v55 = vmax.f32 %v74_v49, 0.0 }
  0x2b   :  { %562 = vmatpush3.bf16.msra.mxu0 %v631_v10  ;;  %v77_v45 = vmax.f32 %v73_v39, 0.0 }
  0x2c   :  { %563 = vmatprep.subr.bf16.mxu0 %v632_v11  ;;  %v137_v51 = vrot.slane %v76_v44, 7  ;;  %v140_v54 = vrot.slane %v79_v46, 7  ;;  %v162_v56 = vrot.slane %v76_v44, 1  ;;  %v165_v58 = vrot.slane %v79_v46, 1 }
  0x2d   :  { %600 = vmatpush3.bf16.msra.mxu1 %v633_v12  ;;  %v138_v52 = vrot.slane %v77_v45, 7  ;;  %v184_v53 = vpack.c.bf16 %v77_v45, %v76_v44  ;;  %v163_v57 = vrot.slane %v77_v45, 1  ;;  %v164_v63 = vrot.slane %v78_v55, 1 }
  0x2e   :  { %601 = vmatprep.subr.bf16.mxu1 %v636_v15  ;;  %v145_v60 = vsel %vm141_vm0, %v140_v54, %v137_v51  ;;  %v170_v1 = vsel %vm166_vm2, %v165_v58, %v162_v56  ;;  %v187_v2 = vpack.c.bf16 %v79_v46, %v78_v55  ;;  %v139_v3 = vrot.slane %v78_v55, 7 }
  0x2f   :  { %564 = vmatpush3.bf16.msra.mxu0 %v634_v13  ;;  %420 = vmatprep.mubr.bf16.mxu0 %v184_v53  ;;  %v144_v59 = vsel %vm141_vm0, %v137_v51, %v138_v52  ;;  %v169_v0 = vsel %vm166_vm2, %v162_v56, %v163_v57  ;;  %v168_v4 = vsel %vm166_vm2, %v163_v57, %v164_v63  ;;  %v510_v13 = vld [vmem:[%s817_s4] ss:$0 sm:$0xff]  ;;  %s718_s4 = smov [#allocation7]  }
  0x30   :  { %565 = vmatprep.subr.bf16.mxu0 %v635_v16  ;;  %v537_v62 = vpack.c.bf16 %v144_v59, %v145_v60  ;;  %v167_v5 = vsel %vm166_vm2, %v164_v63, %v165_v58  ;;  %v545_v6 = vpack.c.bf16 %v168_v4, %v169_v0  ;;  %v142_v8 = vsel %vm141_vm0, %v139_v3, %v140_v54  ;;  %s495_s9 = sshll.u32 %s718_s4, 4  ;;  %s496_s9 = int_to_ptr.vmem [resolvable:$true] %s495_s9 }
  0x31   :  { %602 = vmatpush3.bf16.msra.mxu1 %v636_v15  ;;  %v549_v7 = vpack.c.bf16 %v170_v1, %v167_v5  ;;  %v143_v9 = vsel %vm141_vm0, %v138_v52, %v139_v3  ;;  %s685_s10 = scalar_lea.vmem %s496_s9, 512  ;;  %p690_p11 = scmp.lt.s32.totalorder %s496_s9, %s496_s9 }
  0x32   :  { %603 = vmatprep.subr.bf16.mxu1 %v639_v19  ;;  %609 = vmatprep.mubr.msk.bf16.mxu1 %vm544_vm7, %v545_v6  ;;  %v541_v10 = vpack.c.bf16 %v142_v8, %v143_v9  ;;  %p686_p10 = scmp.ne.s32.totalorder %s496_s9, %s685_s10  ;;  %p691_p12 = scmp.lt.s32.totalorder %s685_s10, %s685_s10 }
  0x33   :  { %566 = vmatpush3.bf16.msra.mxu0 %v637_v17 }
  0x34   :  { %567 = vmatprep.subr.bf16.mxu0 %v638_v20  ;;  %p692_p13 = por %p691_p12, %p690_p11 }
  0x35   :  { %604 = vmatpush3.bf16.msra.mxu1 %v639_v19 }
  0x36   :  { %605 = vmatprep.subr.bf16.mxu1 %v642_v22  ;;  %p693_p0 = pnand %p692_p13, %p686_p10 }
  0x37   :  { %568 = vmatpush3.bf16.msra.mxu0 %v640_v21 }
  0x38   :  { %569 = vmatprep.subr.bf16.mxu0 %v641_v27 }
  0x39   :  { %606 = vmatpush3.bf16.msra.mxu1 %v642_v22 }
  0x3a   :  { %607 = vmatprep.subr.bf16.mxu1 %v644_v41 }
  0x3b   :  { %570 = vmatpush3.bf16.msra.mxu0 %v643_v37 }
  0x3d   :  { %608 = vmatpush3.bf16.msra.mxu1 %v644_v41 }
  0x3e   :  { %538 = vmatmul.mubr.msk.bf16.vlgmr.msra.gmra.mxu0 %vm536_vm5, %v537_v62 }
  0x3f   :  { %428 = vmatprep.mubr.bf16.mxu0 %v187_v2 }
  0x40   :  { %610 = vmatmul.mubr.msk.bf16.vlgmr.msra.gmra.mxu1 %vm548_vm8, %v549_v7 }
  0x46   :  { %542 = vmatmul.mubr.msk.bf16.gmra.mxu0 %vm540_vm10, %v541_v10 }
  0xfe   :  { %v571_v11 = vpop.f32.mrf.mxu0 }
 0x100   :  { %v572_v12 = vpop.f32.mrf.mxu0  ;;  %v611_v16 = vpop.f32.mrf.mxu1 }
 0x101   :  { %v573_v14 = vadd.f32 %v572_v12, %v571_v11 }
 0x102   :  { %v574_v15 = vpop.f32.mrf.mxu0  ;;  %v471_v18 = vpop.f32.mrf.mxu1 }
 0x103   :  { %v423_v17 = vadd.f32 %v573_v14, %v510_v13 }
 0x104   :  { %v575_v19 = vpop.f32.mrf.mxu0  ;;  %v612_v23 = vpop.f32.mrf.mxu1 }
 0x105   :  { %v576_v20 = vadd.f32 %v575_v19, %v574_v15  ;;  %v472_v21 = vadd.f32 %v471_v18, %v423_v17 }
 0x106   :  { %v577_v22 = vpop.f32.mrf.mxu0  ;;  %v474_v26 = vpop.f32.mrf.mxu1 }
 0x107   :  { %486 = vst [vmem:[#allocation7] sm:$0xff] %v472_v21  ;;  %v426_v24 = vadd.f32 %v576_v20, %v510_v13 }
 0x108   :  { %v578_v25 = vpop.f32.mrf.mxu0 }
 0x109   :  { %v579_v27 = vadd.f32 %v578_v25, %v577_v22  ;;  %v475_v28 = vadd.f32 %v474_v26, %v426_v24 }
 0x10a   :  { %v580_v29 = vpop.f32.mrf.mxu0 }
 0x10b   :  { %v431_v30 = vadd.f32 %v579_v27, %v510_v13  ;;  %487 = vst [vmem:[#allocation7 + $0x8] sm:$0xff] %v475_v28 }
 0x10c   :  { %v581_v31 = vpop.f32.mrf.mxu0 }
 0x10d   :  { %v480_v32 = vadd.f32 %v611_v16, %v431_v30  ;;  %v582_v33 = vadd.f32 %v581_v31, %v580_v29 }
 0x10f   :  { %488 = vst [vmem:[#allocation7 + $0x10] sm:$0xff] %v480_v32  ;;  %v434_v34 = vadd.f32 %v582_v33, %v510_v13 }
 0x111   :  { %v483_v35 = vadd.f32 %v612_v23, %v434_v34 }
 0x113   :  { %489 = vst [vmem:[#allocation7 + $0x18] sm:$0xff] %v483_v35 }
 0x114   :  { %696 = shalt.err (!%p693_p0)
}
 0x115   :  { %501 = dma.vmem_to_hbm [thread:$0]  %s496_s9, 512, %s818_s5, [#allocation4], %s712_s21, %s712_s21, %s713_s22  }
 0x116   :  { %709 = dma.done.wait [#allocation4], 512  }
 0x117   :  { %710 = vsyncadd [#allocation4], 4294966784 }
 0x118   :  { %505 = vsyncpa [#allocation3], 1 }
 0x119   :  { %506 = vsyncpa [#allocation6], 1 }
 0x11a   :  { %507 = vsyncpa [#allocation4], 1 }

</bundles_post_ra>
